<compile_context>
chip_gen: v5e
topology: v5e:2x2
jax: 0.10.0
libtpu: 0.0.40
codegen_flags: <defaults>
</compile_context>

<pallas_src>
import functools

import jax
import jax.numpy as jnp
from jax.experimental import pallas as pl
from jax.experimental.pallas import tpu as pltpu


# ----------------------------------------------------------------------------
# Per-generation configuration (VMEM size, TensorCores per chip) + budgeting
# ----------------------------------------------------------------------------
_TWO_PASS_TILE_BYTES = 4 << 20   # target x-block bytes in the tiled fallback
_VMEM_HEADROOM = 2 << 20         # compiler internal scratch / small f32 temps
_MIN_SPLIT_BYTES = 1 << 20       # below this, multi-core sharding isn't worth it


def _tpu_config():
    """Returns (per-core VMEM bytes, TensorCores per chip), defensively queried."""
    vmem_bytes = None
    num_cores = None
    try:
        info = pltpu.get_tpu_info()
        for name in ("vmem_capacity_bytes", "vmem_bytes", "vmem_size_bytes"):
            v = getattr(info, name, None)
            if v:
                vmem_bytes = int(v)
                break
        for name in ("num_tensorcores", "tensorcores_per_chip", "num_cores",
                     "core_count"):
            v = getattr(info, name, None)
            if v:
                num_cores = int(v)
                break
    except Exception:
        pass
    if vmem_bytes is None:
        kind = ""
        try:
            kind = str(getattr(jax.devices()[0], "device_kind", "")).lower()
        except Exception:
            pass
        vmem_bytes = (64 << 20) if ("v7" in kind or "7x" in kind) else (128 << 20)
    if num_cores is None:
        num_cores = 2 if vmem_bytes <= (64 << 20) else 1
    # Multi-TC parts (v7x) have 64 MiB VMEM per TensorCore; be conservative.
    if num_cores >= 2:
        vmem_bytes = min(vmem_bytes, 64 << 20)
    vmem_bytes = min(vmem_bytes, 128 << 20)
    return vmem_bytes, num_cores


def _budgets(vmem_bytes):
    """(fused pipeline budget, cap passed as vmem_limit_bytes)."""
    vmem_cap = min(vmem_bytes - (16 << 20), (vmem_bytes * 7) // 8)  # 112 / 48 MiB
    fused_budget = (vmem_cap * 3) // 4                              # 84 / 36 MiB
    return fused_budget, vmem_cap


def _vmem_limit(pipeline_bytes, vmem_cap):
    return int(min(max(pipeline_bytes + _VMEM_HEADROOM, 16 << 20), vmem_cap))


def _pick_batch_tile(B, per_elem_block_bytes, fused_budget, num_cores):
    """Largest divisor Bt of B whose 4x-buffered block fits the budget.  On
    multi-TensorCore chips also keep >= num_cores grid steps (when B allows) so
    every core gets work; single-TC chips take the largest block that fits."""
    best = 1
    for bt in range(1, B + 1):
        if B % bt:
            continue
        if 4 * bt * per_elem_block_bytes > fused_budget:
            continue
        if num_cores > 1 and B >= num_cores and (B // bt) < num_cores:
            continue
        best = max(best, bt)
    return best


def _pick_hw_tile(C, HW, itemsize, hw_tile, shards):
    if hw_tile is not None:
        thw = min(int(hw_tile), HW)
    else:
        thw = max(128, (_TWO_PASS_TILE_BYTES // (C * itemsize)) // 128 * 128)
    if shards > 1:
        # Cap the tile so each spatial shard owns at least one tile.
        per_shard = -(-HW // shards)
        thw = min(thw, max(128, ((per_shard + 127) // 128) * 128))
    if thw >= HW:
        return HW                        # block == full extent, no lane padding
    return max(128, (thw // 128) * 128)  # sub-extent tiles must be lane-aligned


# ----------------------------------------------------------------------------
# Fused single-pass kernel: pool -> tiny MLP -> scale on a resident (Bt, C, HW)
# slab.  Used whenever 4x the block fits the VMEM budget (single HBM read).
# ----------------------------------------------------------------------------
def _cam_fused_kernel(x_ref, w1a_ref, w1m_ref, b1_ref, w2t_ref, b2_ref, o_ref):
    # Pooling accumulates in f32 straight off the Ref; each x_ref[...] read has
    # exactly one consumer, so no block-sized f32 temporary is held live across
    # the MLP (Mosaic streams the reductions / the scale sweep vreg-at-a-time).
    #
    # NOTE(padding): this block spans the FULL spatial extent, so x_ref.shape[-1]
    # is the true H*W; Mosaic masks physically padded lanes of the logical
    # extent in both reductions (exercised by the HW=135 fused-path test below).
    hw = x_ref.shape[-1]
    avg = jnp.sum(x_ref[...], axis=-1, dtype=jnp.float32) * (1.0 / hw)   # (Bt, C)
    mx = jnp.max(x_ref[...], axis=-1).astype(jnp.float32)                # (Bt, C)

    # Concat-free first Linear: W1 pre-split into avg/max halves -> two dots.
    h = jnp.dot(avg, w1a_ref[...], preferred_element_type=jnp.float32)
    h = h + jnp.dot(mx, w1m_ref[...], preferred_element_type=jnp.float32)
    h = jnp.maximum(h + b1_ref[...], 0.0)             # (Bt, hidden)

    attn = jnp.dot(h, w2t_ref[...], preferred_element_type=jnp.float32)
    attn = attn + b2_ref[...]                          # (Bt, C)

    # Re-read x for the scale sweep; multiply in f32, cast back on store.
    o_ref[...] = (x_ref[...].astype(jnp.float32)
                  * attn[:, :, None]).astype(o_ref.dtype)


# ----------------------------------------------------------------------------
# Two-pass fallback (large C*HW, or B < num_cores on multi-TC chips).
# Pass 1: sum/max pooling tiled over HW ("arbitrary" reduction axis), optionally
#         sharding the spatial axis `shards` ways over the parallel grid axis so
#         every TensorCore gets work; padded / out-of-range lanes are masked.
# Pass 2: scale pass tiled over (B, HW) — fully parallel.
# ----------------------------------------------------------------------------
def _cam_pool_kernel(x_ref, sum_ref, max_ref, *, hw_total, hw_tile,
                     n_hw_shard, shards, needs_mask):
    k = pl.program_id(1)

    @pl.when(k == 0)
    def _():
        sum_ref[...] = jnp.zeros_like(sum_ref)
        max_ref[...] = jnp.full_like(max_ref, -jnp.inf)

    x = x_ref[...].astype(jnp.float32)               # (1, C, thw)
    if needs_mask:
        # Tiles that extend past (or lie entirely beyond) the true spatial
        # extent: mask with 0 for the sum and -inf for the max.  `tile` is the
        # UNCLAMPED tile index, so fully out-of-range tiles (clamped by the
        # index_map to a valid DMA source) contribute nothing.
        shard = (pl.program_id(0) % shards) if shards > 1 else 0
        tile = shard * n_hw_shard + k
        pos = tile * hw_tile + jax.lax.broadcasted_iota(jnp.int32, x.shape, 2)
        valid = pos < hw_total
        x_sum = jnp.where(valid, x, 0.0)
        x_max = jnp.where(valid, x, -jnp.inf)
    else:
        x_sum = x
        x_max = x

    sum_ref[...] += jnp.sum(x_sum, axis=-1, keepdims=True)
    max_ref[...] = jnp.maximum(max_ref[...],
                               jnp.max(x_max, axis=-1, keepdims=True))


def _cam_scale_kernel(x_ref, attn_ref, o_ref):
    # attn_ref is the full (B, C) lane-dense table; select this batch's row.
    attn = attn_ref[pl.ds(pl.program_id(0), 1), :]                 # (1, C)
    o_ref[...] = (x_ref[...].astype(jnp.float32)
                  * attn[:, :, None]).astype(o_ref.dtype)


# ----------------------------------------------------------------------------
# Wrapper
# ----------------------------------------------------------------------------
def channel_attention_module(x, w1, b1, w2, b2, *, force_two_pass=False,
                             hw_tile=None):
    """CBAM-style channel attention matching the PyTorch forward.

    x : (B, C, H, W) float32 (bf16 I/O also supported; stats/MLP stay f32)
    w1: (hidden, 2C), b1: (hidden,)   -- Linear on cat([avg_pool, max_pool])
    w2: (C, hidden),  b2: (C,)        -- Linear back to C channels
    """
    B, C, H, W = x.shape
    HW = H * W
    hidden = w1.shape[0]
    itemsize = x.dtype.itemsize
    x_flat = x.reshape(B, C, HW)

    vmem_bytes, num_cores = _tpu_config()
    fused_budget, vmem_cap = _budgets(vmem_bytes)

    # Split the first Linear into its avg / max halves (removes the concat).
    w1a, w1m = w1[:, :C], w1[:, C:]
    weight_bytes = int((w1a.size + w1m.size + b1.size + w2.size + b2.size)
                       * w1.dtype.itemsize)

    per_elem_block_bytes = C * HW * itemsize
    fused_ok = (4 * per_elem_block_bytes) <= fused_budget

    # On multi-TC chips, a B < num_cores workload big enough to be HBM-bound is
    # routed to the two-pass path so the spatial axis can be sharded across
    # cores (a fused grid smaller than num_cores would idle a TensorCore).
    split_across_cores = (num_cores > 1 and B < num_cores
                          and HW >= 2 * 128
                          and per_elem_block_bytes >= _MIN_SPLIT_BYTES)

    if fused_ok and not force_two_pass and not split_across_cores:
        # ---------------- fused single-pass path ----------------
        Bt = _pick_batch_tile(B, per_elem_block_bytes, fused_budget, num_cores)
        pipeline_bytes = (4 * Bt * per_elem_block_bytes + 2 * weight_bytes
                          + (1 << 20))   # + internal scratch / small f32 temps
        out_flat = pl.pallas_call(
            _cam_fused_kernel,
            out_shape=jax.ShapeDtypeStruct((B, C, HW), x.dtype),
            grid_spec=pltpu.PrefetchScalarGridSpec(
                num_scalar_prefetch=0,
                grid=(B // Bt,),
                in_specs=[
                    pl.BlockSpec((Bt, C, HW), lambda b: (b, 0, 0)),
                    pl.BlockSpec((C, hidden), lambda b: (0, 0)),
                    pl.BlockSpec((C, hidden), lambda b: (0, 0)),
                    pl.BlockSpec((1, hidden), lambda b: (0, 0)),
                    pl.BlockSpec((hidden, C), lambda b: (0, 0)),
                    pl.BlockSpec((1, C), lambda b: (0, 0)),
                ],
                out_specs=pl.BlockSpec((Bt, C, HW), lambda b: (b, 0, 0)),
            ),
            compiler_params=pltpu.CompilerParams(
                dimension_semantics=("parallel",),
                vmem_limit_bytes=_vmem_limit(pipeline_bytes, vmem_cap)),
        )(x_flat, w1a.T, w1m.T, b1.reshape(1, hidden), w2.T, b2.reshape(1, C))
        return out_flat.reshape(B, C, H, W)

    # ---------------- two-pass tiled path ----------------
    shards = 1
    if num_cores > 1 and B < num_cores and HW >= 2 * 128:
        shards = num_cores        # shard the spatial axis across TensorCores

    thw = _pick_hw_tile(C, HW, itemsize, hw_tile, shards)
    n_hw_total = pl.cdiv(HW, thw)
    shards = min(shards, n_hw_total)
    n_hw_shard = pl.cdiv(n_hw_total, shards)
    needs_mask = (shards * n_hw_shard * thw) != HW
    x_block_bytes = C * thw * itemsize

    if shards == 1:
        x_pool_index = lambda b, k: (b, 0, k)
    else:
        def x_pool_index(bs, k):
            tile = (bs % shards) * n_hw_shard + k
            # Out-of-range tiles of the last shard are clamped to a valid DMA
            # source; the kernel fully masks them (0 / -inf contributions).
            return (bs // shards, 0, jnp.minimum(tile, n_hw_total - 1))

    # Pass 1: pooled partial sum / max per (virtual batch, channel).
    x_sum, x_max = pl.pallas_call(
        functools.partial(_cam_pool_kernel, hw_total=HW, hw_tile=thw,
                          n_hw_shard=n_hw_shard, shards=shards,
                          needs_mask=needs_mask),
        out_shape=(jax.ShapeDtypeStruct((B * shards, C, 1), jnp.float32),
                   jax.ShapeDtypeStruct((B * shards, C, 1), jnp.float32)),
        grid_spec=pltpu.PrefetchScalarGridSpec(
            num_scalar_prefetch=0,
            grid=(B * shards, n_hw_shard),
            in_specs=[pl.BlockSpec((1, C, thw), x_pool_index)],
            out_specs=[pl.BlockSpec((1, C, 1), lambda bs, k: (bs, 0, 0)),
                       pl.BlockSpec((1, C, 1), lambda bs, k: (bs, 0, 0))],
        ),
        compiler_params=pltpu.CompilerParams(
            dimension_semantics=("parallel", "arbitrary"),
            vmem_limit_bytes=_vmem_limit(
                2 * x_block_bytes + 3 * C * thw * 4, vmem_cap)),
    )(x_flat)

    # Tiny MLP (O(C*hidden) flops — noise) in plain JAX, f32: combine the shard
    # partials and divide by the TRUE H*W.
    avg = x_sum[..., 0].reshape(B, shards, C).sum(axis=1) * (1.0 / HW)   # (B, C)
    mx = x_max[..., 0].reshape(B, shards, C).max(axis=1)                 # (B, C)
    h = jnp.maximum(avg @ w1a.T + mx @ w1m.T + b1, 0.0)
    attn = (h @ w2.T + b2).astype(jnp.float32)                           # (B, C)

    # Pass 2: scale, tiled over (B, HW) — both axes parallel; attn is a tiny
    # lane-dense full-extent block, row-selected in-kernel.
    out_flat = pl.pallas_call(
        _cam_scale_kernel,
        out_shape=jax.ShapeDtypeStruct((B, C, HW), x.dtype),
        grid_spec=pltpu.PrefetchScalarGridSpec(
            num_scalar_prefetch=0,
            grid=(B, n_hw_total),
            in_specs=[pl.BlockSpec((1, C, thw), lambda b, k: (b, 0, k)),
                      pl.BlockSpec((B, C), lambda b, k: (0, 0))],
            out_specs=pl.BlockSpec((1, C, thw), lambda b, k: (b, 0, k)),
        ),
        compiler_params=pltpu.CompilerParams(
            dimension_semantics=("parallel", "parallel"),
            vmem_limit_bytes=_vmem_limit(
                4 * x_block_bytes + C * thw * 4 + B * C * 4, vmem_cap)),
    )(x_flat, attn)
    return out_flat.reshape(B, C, H, W)


# ----------------------------------------------------------------------------
# Pure-JAX reference mirroring the PyTorch forward.
# ----------------------------------------------------------------------------
def _reference(x, w1, b1, w2, b2):
    avg = jnp.mean(x, axis=(2, 3))                   # (B, C)
    mx = jnp.max(x, axis=(2, 3))                     # (B, C)
    feat = jnp.concatenate([avg, mx], axis=1)        # (B, 2C)
    h = jnp.maximum(feat @ w1.T + b1, 0.0)
    attn = h @ w2.T + b2                             # (B, C)
    return x * attn[:, :, None, None]


if __name__ == "__main__":
    key = jax.random.PRNGKey(0)

    def make_params(pkey, C, reduction_ratio=16):
        # Deterministic init mimicking nn.Linear defaults (uniform ±1/sqrt(fan_in)).
        # TODO(synk): the PyTorch module re-initializes its MLP randomly on every
        # forward; here the weights are fixed kernel inputs instead.
        hidden = max(C // reduction_ratio, 1)
        kw1, kb1, kw2, kb2 = jax.random.split(pkey, 4)
        bound1 = 1.0 / jnp.sqrt(2.0 * C)
        w1 = jax.random.uniform(kw1, (hidden, 2 * C), jnp.float32, -bound1, bound1)
        b1 = jax.random.uniform(kb1, (hidden,), jnp.float32, -bound1, bound1)
        bound2 = 1.0 / jnp.sqrt(float(hidden))
        w2 = jax.random.uniform(kw2, (C, hidden), jnp.float32, -bound2, bound2)
        b2 = jax.random.uniform(kb2, (C,), jnp.float32, -bound2, bound2)
        return w1, b1, w2, b2

    k1, k2, k3, k4, kp1, kp2, kp3, kp4 = jax.random.split(key, 8)

    # --- Test 1: fused single-pass path (small map, lane-aligned HW).
    B, C, H, W = 4, 32, 16, 16
    x = jax.random.normal(k1, (B, C, H, W), dtype=jnp.float32)
    w1, b1, w2, b2 = make_params(kp1, C)
    out = jax.block_until_ready(channel_attention_module(x, w1, b1, w2, b2))
    ref = _reference(x, w1, b1, w2, b2)
    assert out.shape == (B, C, H, W)
    assert jnp.allclose(out, ref, atol=1e-5, rtol=1e-5), "fused path mismatch"

    # --- Test 2: fused path with HW = 135 (not a multiple of 128): confirms the
    #     full-extent reductions correctly ignore physically padded lanes.
    B2, C2, H2, W2 = 2, 32, 9, 15
    x2 = jax.random.normal(k2, (B2, C2, H2, W2), dtype=jnp.float32)
    w1b, b1b, w2b, b2b = make_params(kp2, C2)
    out2 = jax.block_until_ready(channel_attention_module(x2, w1b, b1b, w2b, b2b))
    ref2 = _reference(x2, w1b, b1b, w2b, b2b)
    assert out2.shape == (B2, C2, H2, W2)
    assert jnp.allclose(out2, ref2, atol=1e-5, rtol=1e-5), "fused unaligned mismatch"

    # --- Test 3: forced two-pass path with hw_tile=128; HW=135 exercises the
    #     padded-lane masking in the pooling kernel.
    out3 = jax.block_until_ready(
        channel_attention_module(x2, w1b, b1b, w2b, b2b,
                                 force_two_pass=True, hw_tile=128))
    assert out3.shape == (B2, C2, H2, W2)
    assert jnp.allclose(out3, ref2, atol=1e-5, rtol=1e-5), "two-pass path mismatch"

    # --- Test 4: B == 1, larger map.  On multi-TensorCore chips this takes the
    #     two-pass path with the pooling pass sharded across the spatial axis
    #     (both cores busy); on single-TC chips it stays on the fused path.
    B4, C4, H4, W4 = 1, 64, 80, 80
    x4 = jax.random.normal(k4, (B4, C4, H4, W4), dtype=jnp.float32)
    w1d, b1d, w2d, b2d = make_params(kp4, C4)
    out4 = jax.block_until_ready(channel_attention_module(x4, w1d, b1d, w2d, b2d))
    ref4 = _reference(x4, w1d, b1d, w2d, b2d)
    assert out4.shape == (B4, C4, H4, W4)
    assert jnp.allclose(out4, ref4, atol=1e-4, rtol=1e-4), "B=1 split path mismatch"

    print("KERNEL_OK")
</pallas_src>

<mosaic_0001>
module attributes {stable_mosaic.version = 11 : i64} {
  func.func @_cam_fused_kernel(%arg0: i32, %arg1: memref<4x32x256xf32, #tpu.memory_space<vmem>>, %arg2: memref<32x2xf32, #tpu.memory_space<vmem>>, %arg3: memref<32x2xf32, #tpu.memory_space<vmem>>, %arg4: memref<1x2xf32, #tpu.memory_space<vmem>>, %arg5: memref<2x32xf32, #tpu.memory_space<vmem>>, %arg6: memref<1x32xf32, #tpu.memory_space<vmem>>, %arg7: memref<4x32x256xf32, #tpu.memory_space<vmem>>) attributes {dimension_semantics = [#tpu.dimension_semantics<parallel>], iteration_bounds = array<i64: 1>, scalar_prefetch = 0 : i64, scratch_operands = 0 : i64, tpu.core_type = #tpu.core_type<tc>, window_params = [{transform_indices = @transform_0, window_bounds = array<i64: 4, 32, 256>}, {pipeline_mode = #tpu.pipeline_mode<synchronous>, transform_indices = @transform_1, window_bounds = array<i64: 32, 2>}, {pipeline_mode = #tpu.pipeline_mode<synchronous>, transform_indices = @transform_2, window_bounds = array<i64: 32, 2>}, {pipeline_mode = #tpu.pipeline_mode<synchronous>, transform_indices = @transform_3, window_bounds = array<i64: 1, 2>}, {pipeline_mode = #tpu.pipeline_mode<synchronous>, transform_indices = @transform_4, window_bounds = array<i64: 2, 32>}, {pipeline_mode = #tpu.pipeline_mode<synchronous>, transform_indices = @transform_5, window_bounds = array<i64: 1, 32>}, {transform_indices = @transform_6, window_bounds = array<i64: 4, 32, 256>}]} {
    %c0 = arith.constant 0 : index
    %c0_0 = arith.constant 0 : index
    %c0_1 = arith.constant 0 : index
    %0 = vector.load %arg1[%c0, %c0_0, %c0_1] : memref<4x32x256xf32, #tpu.memory_space<vmem>>, vector<4x32x256xf32>
    %cst = arith.constant dense<0.000000e+00> : vector<4x32xf32>
    %1 = vector.multi_reduction <add>, %0, %cst [2] : vector<4x32x256xf32> to vector<4x32xf32>
    %cst_2 = arith.constant 3.906250e-03 : f32
    %2 = vector.broadcast %cst_2 : f32 to vector<4x32xf32>
    %3 = arith.mulf %1, %2 : vector<4x32xf32>
    %c0_3 = arith.constant 0 : index
    %c0_4 = arith.constant 0 : index
    %c0_5 = arith.constant 0 : index
    %4 = vector.load %arg1[%c0_3, %c0_4, %c0_5] : memref<4x32x256xf32, #tpu.memory_space<vmem>>, vector<4x32x256xf32>
    %cst_6 = arith.constant dense<0xFF800000> : vector<4x32xf32>
    %5 = vector.multi_reduction <maximumf>, %4, %cst_6 [2] : vector<4x32x256xf32> to vector<4x32xf32>
    %c0_7 = arith.constant 0 : index
    %c0_8 = arith.constant 0 : index
    %6 = vector.load %arg2[%c0_7, %c0_8] : memref<32x2xf32, #tpu.memory_space<vmem>>, vector<32x2xf32>
    %cst_9 = arith.constant dense<0.000000e+00> : vector<4x2xf32>
    %7 = tpu.matmul %3, %6, %cst_9 {dimension_numbers = #tpu.dot_dimension_numbers<[1], [0], [0], [1], [0, 0, 1, 1], [], []>} : vector<4x32xf32>, vector<32x2xf32>, vector<4x2xf32> -> vector<4x2xf32>
    %c0_10 = arith.constant 0 : index
    %c0_11 = arith.constant 0 : index
    %8 = vector.load %arg3[%c0_10, %c0_11] : memref<32x2xf32, #tpu.memory_space<vmem>>, vector<32x2xf32>
    %cst_12 = arith.constant dense<0.000000e+00> : vector<4x2xf32>
    %9 = tpu.matmul %5, %8, %cst_12 {dimension_numbers = #tpu.dot_dimension_numbers<[1], [0], [0], [1], [0, 0, 1, 1], [], []>} : vector<4x32xf32>, vector<32x2xf32>, vector<4x2xf32> -> vector<4x2xf32>
    %10 = arith.addf %7, %9 : vector<4x2xf32>
    %c0_13 = arith.constant 0 : index
    %c0_14 = arith.constant 0 : index
    %11 = vector.load %arg4[%c0_13, %c0_14] : memref<1x2xf32, #tpu.memory_space<vmem>>, vector<1x2xf32>
    %12 = vector.broadcast %11 : vector<1x2xf32> to vector<4x2xf32>
    %13 = arith.addf %10, %12 : vector<4x2xf32>
    %cst_15 = arith.constant 0.000000e+00 : f32
    %14 = vector.broadcast %cst_15 : f32 to vector<4x2xf32>
    %15 = arith.maximumf %13, %14 : vector<4x2xf32>
    %c0_16 = arith.constant 0 : index
    %c0_17 = arith.constant 0 : index
    %16 = vector.load %arg5[%c0_16, %c0_17] : memref<2x32xf32, #tpu.memory_space<vmem>>, vector<2x32xf32>
    %cst_18 = arith.constant dense<0.000000e+00> : vector<4x32xf32>
    %17 = tpu.matmul %15, %16, %cst_18 {dimension_numbers = #tpu.dot_dimension_numbers<[1], [0], [0], [1], [0, 0, 1, 1], [], []>} : vector<4x2xf32>, vector<2x32xf32>, vector<4x32xf32> -> vector<4x32xf32>
    %c0_19 = arith.constant 0 : index
    %c0_20 = arith.constant 0 : index
    %18 = vector.load %arg6[%c0_19, %c0_20] : memref<1x32xf32, #tpu.memory_space<vmem>>, vector<1x32xf32>
    %19 = vector.broadcast %18 : vector<1x32xf32> to vector<4x32xf32>
    %20 = arith.addf %17, %19 : vector<4x32xf32>
    %c0_21 = arith.constant 0 : index
    %c0_22 = arith.constant 0 : index
    %c0_23 = arith.constant 0 : index
    %21 = vector.load %arg1[%c0_21, %c0_22, %c0_23] : memref<4x32x256xf32, #tpu.memory_space<vmem>>, vector<4x32x256xf32>
    %22 = vector.shape_cast %20 : vector<4x32xf32> to vector<4x32x1xf32>
    %23 = vector.broadcast %22 : vector<4x32x1xf32> to vector<4x32x256xf32>
    %24 = arith.mulf %21, %23 : vector<4x32x256xf32>
    %c0_24 = arith.constant 0 : index
    %c0_25 = arith.constant 0 : index
    %c0_26 = arith.constant 0 : index
    %25 = vector.load %arg7[%c0_24, %c0_25, %c0_26] : memref<4x32x256xf32, #tpu.memory_space<vmem>>, vector<4x32x256xf32>
    tpu.vector_store %arg7[%c0_24, %c0_25, %c0_26], %24 {strides = array<i32>} : memref<4x32x256xf32, #tpu.memory_space<vmem>>, vector<4x32x256xf32>,
    return
  }
  func.func @transform_0(%arg0: i32) -> (i32, i32, i32) {
    %c0_i32 = arith.constant 0 : i32
    %c0_i32_0 = arith.constant 0 : i32
    %c0_i32_1 = arith.constant 0 : i32
    return %arg0, %c0_i32, %c0_i32_0 : i32, i32, i32
  }
  func.func @transform_1(%arg0: i32) -> (i32, i32) {
    %c0_i32 = arith.constant 0 : i32
    %c0_i32_0 = arith.constant 0 : i32
    %c0_i32_1 = arith.constant 0 : i32
    return %c0_i32, %c0_i32_0 : i32, i32
  }
  func.func @transform_2(%arg0: i32) -> (i32, i32) {
    %c0_i32 = arith.constant 0 : i32
    %c0_i32_0 = arith.constant 0 : i32
    %c0_i32_1 = arith.constant 0 : i32
    return %c0_i32, %c0_i32_0 : i32, i32
  }
  func.func @transform_3(%arg0: i32) -> (i32, i32) {
    %c0_i32 = arith.constant 0 : i32
    %c0_i32_0 = arith.constant 0 : i32
    %c0_i32_1 = arith.constant 0 : i32
    return %c0_i32, %c0_i32_0 : i32, i32
  }
  func.func @transform_4(%arg0: i32) -> (i32, i32) {
    %c0_i32 = arith.constant 0 : i32
    %c0_i32_0 = arith.constant 0 : i32
    %c0_i32_1 = arith.constant 0 : i32
    return %c0_i32, %c0_i32_0 : i32, i32
  }
  func.func @transform_5(%arg0: i32) -> (i32, i32) {
    %c0_i32 = arith.constant 0 : i32
    %c0_i32_0 = arith.constant 0 : i32
    %c0_i32_1 = arith.constant 0 : i32
    return %c0_i32, %c0_i32_0 : i32, i32
  }
  func.func @transform_6(%arg0: i32) -> (i32, i32, i32) {
    %c0_i32 = arith.constant 0 : i32
    %c0_i32_0 = arith.constant 0 : i32
    %c0_i32_1 = arith.constant 0 : i32
    return %arg0, %c0_i32, %c0_i32_0 : i32, i32, i32
  }
}

</mosaic_0001>

<bundles_post_ra>
// kernel: tpu_custom_call.1
= control target key start
LH: loop header
LB: loop body
LE: loop exit
PB: predicated region body
PF: predicated region fallthrough
CT: control target
= control target key end

     0   :  { %11 = vsyncpa [#allocation3], 0  ;;  %s982_s0 = inlined_call_operand.hbm [shape: f32[4,32,256], index: 0, kind: input, shape index: {}]   ;;  %s983_s1 = inlined_call_operand.vmem [shape: f32[32,2], index: 1, kind: input, shape index: {}]   ;;  %s984_s2 = inlined_call_operand.vmem [shape: f32[32,2], index: 2, kind: input, shape index: {}]   ;;  %s985_s3 = inlined_call_operand.vmem [shape: f32[1,2], index: 3, kind: input, shape index: {}]   ;;  %s986_s4 = inlined_call_operand.vmem [shape: f32[2,32], index: 4, kind: input, shape index: {}]   ;;  %s987_s5 = inlined_call_operand.vmem [shape: f32[1,32], index: 5, kind: input, shape index: {}]   ;;  %s988_s6 = inlined_call_operand.hbm [shape: f32[4,32,256], index: 6, kind: output, shape index: {}]  }
   0x1   :  { %12 = vsyncpa [#allocation4], 0  ;;  %s17_s23 = sshll.u32 %s982_s0, 4  ;;  %s643_s24 = smov [#allocation2]   ;;  %s18_s23 = int_to_ptr.hbm [resolvable:$true] %s17_s23 }
   0x2   :  { %s19_s25 = sshll.u32 %s643_s24, 4  ;;  %s644_s26 = smov 256   ;;  %s20_s25 = int_to_ptr.vmem [resolvable:$true] %s19_s25 }
   0x3   :  { %s645_s27 = smov 16  }
   0x4   :  { %25 = dma.hbm_to_vmem [thread:$0]  %s18_s23, 4096, %s20_s25, [#allocation3], %s644_s26, %s644_s26, %s645_s27  }
   0x5   :  { %639 = dma.done.wait [#allocation3], 4096  }
   0x6   :  { %640 = vsyncadd [#allocation3], 4294963200  ;;  %v688_v0 = vld [vmem:[#allocation2 + $0x40] sm:$0xff]  ;;  %v690_v1 = vld [vmem:[#allocation2 + $0x48] sm:$0xff]  ;;  %vm213_vm0 = vcmask 130112   ;;  %vm217_vm1 = vcmask 195712  }
   0x7   :  { %v692_v2 = vld [vmem:[#allocation2 + $0x20] sm:$0xff]  ;;  %v84_v3 = vadd.f32 %v690_v1, %v688_v0  ;;  %v696_v4 = vld [vmem:[#allocation2 + $0x28] sm:$0xff]  ;;  %v706_v9 = vld [vmem:[#allocation2 + $0x50] sm:$0xff]  ;;  %v148_v45 = vmax.f32 %v688_v0, %v690_v1  ;;  %vm221_vm2 = vcmask 261312   ;;  %vm244_vm3 = vcmask 1041409   ;;  %s551_s24 = sshll.u32 %s988_s6, 4  ;;  %s552_s24 = int_to_ptr.hbm [resolvable:$true] %s551_s24 }
   0x8   :  { %v698_v5 = vld [vmem:[#allocation2] sm:$0xff]  ;;  %v700_v6 = vld [vmem:[#allocation2 + $0x8] sm:$0xff]  ;;  %v78_v7 = vadd.f32 %v696_v4, %v692_v2  ;;  %v708_v10 = vld [vmem:[#allocation2 + $0x58] sm:$0xff]  ;;  %v142_v48 = vmax.f32 %v692_v2, %v696_v4  ;;  %vm246_vm4 = vcmask 1042434   ;;  %vm248_vm5 = vcmask 1043459  }
   0x9   :  { %v72_v8 = vadd.f32 %v700_v6, %v698_v5  ;;  %85 = vadd.xlane.f32.xlu1 %v84_v3  ;;  %v710_v11 = vld [vmem:[#allocation2 + $0x60] sm:$0xff]  ;;  %v712_v12 = vld [vmem:[#allocation2 + $0x68] sm:$0xff]  ;;  %v714_v13 = vld [vmem:[#allocation2 + $0x10] sm:$0xff]  ;;  %v87_v15 = vadd.f32 %v708_v10, %v706_v9  ;;  %v136_v38 = vmax.f32 %v698_v5, %v700_v6  ;;  %v151_v43 = vmax.f32 %v706_v9, %v708_v10 }
   0xa   :  { %79 = vadd.xlane.f32.xlu2 %v78_v7  ;;  %v716_v14 = vld [vmem:[#allocation2 + $0x18] sm:$0xff]  ;;  %v90_v16 = vadd.f32 %v712_v12, %v710_v11  ;;  %v724_v18 = vld [vmem:[#allocation2 + $0x90] sm:$0xff]  ;;  %v732_v22 = vld [vmem:[#allocation2 + $0x80] sm:$0xff]  ;;  %v154_v49 = vmax.f32 %v710_v11, %v712_v12  ;;  %vm250_vm6 = vcmask 261120   ;;  %vm357_vm7 = vcmask 1041408  }
   0xb   :  { %73 = vadd.xlane.f32.xlu0 %v72_v8  ;;  %v75_v17 = vadd.f32 %v716_v14, %v714_v13  ;;  %v726_v19 = vld [vmem:[#allocation2 + $0x98] sm:$0xff]  ;;  %v728_v20 = vld [vmem:[#allocation2 + $0x30] sm:$0xff]  ;;  %v734_v23 = vld [vmem:[#allocation2 + $0x88] sm:$0xff]  ;;  %v139_v39 = vmax.f32 %v714_v13, %v716_v14  ;;  %vm353_vm8 = vcmask 15360  }
   0xc   :  { %v730_v21 = vld [vmem:[#allocation2 + $0x38] sm:$0xff]  ;;  %v99_v24 = vadd.f32 %v726_v19, %v724_v18  ;;  %v96_v26 = vadd.f32 %v734_v23, %v732_v22  ;;  %v742_v27 = vld [vmem:[#allocation2 + $0xa0] sm:$0xff]  ;;  %v744_v28 = vld [vmem:[#allocation2 + $0xa8] sm:$0xff]  ;;  %v163_v53 = vmax.f32 %v724_v18, %v726_v19  ;;  %v160_v55 = vmax.f32 %v732_v22, %v734_v23 }
   0xd   :  { %v81_v25 = vadd.f32 %v730_v21, %v728_v20  ;;  %v746_v29 = vld [vmem:[#allocation2 + $0xc0] sm:$0xff]  ;;  %v748_v30 = vld [vmem:[#allocation2 + $0xc8] sm:$0xff]  ;;  %v750_v31 = vld [vmem:[#allocation2 + $0x70] sm:$0xff]  ;;  %v102_v33 = vadd.f32 %v744_v28, %v742_v27  ;;  %v166_v57 = vmax.f32 %v742_v27, %v744_v28  ;;  %v145_v58 = vmax.f32 %v728_v20, %v730_v21 }
   0xe   :  { %995 = vst [vmem:[#allocation8_spill] sm:$0xff] %v748_v30  ;;  %v752_v32 = vld [vmem:[#allocation2 + $0x78] sm:$0xff]  ;;  %v108_v34 = vadd.f32 %v748_v30, %v746_v29  ;;  %v760_v36 = vld [vmem:[#allocation2 + $0xd0] sm:$0xff]  ;;  %v780_v46 = vld [vmem:[#allocation2 + $0xe0] sm:$0xff]  ;;  %v172_v61 = vmax.f32 %v746_v29, %v748_v30 }
   0xf   :  { %v93_v35 = vadd.f32 %v752_v32, %v750_v31  ;;  %v762_v37 = vld [vmem:[#allocation2 + $0xd8] sm:$0xff]  ;;  %v770_v41 = vld [vmem:[#allocation2 + $0xb0] sm:$0xff]  ;;  %996 = vst [vmem:[#allocation9_spill] sm:$0xff] %v780_v46  ;;  %v782_v47 = vld [vmem:[#allocation2 + $0xe8] sm:$0xff]  ;;  %v157_v56 = vmax.f32 %v750_v31, %v752_v32 }
  0x10   :  { %v111_v40 = vadd.f32 %v762_v37, %v760_v36  ;;  %v772_v42 = vld [vmem:[#allocation2 + $0xb8] sm:$0xff]  ;;  %997 = vst [vmem:[#allocation10_spill] sm:$0xff] %v782_v47  ;;  %v114_v50 = vadd.f32 %v782_v47, %v780_v46  ;;  %v790_v51 = vld [vmem:[#allocation2 + $0xf0] sm:$0xff]  ;;  %v175_v59 = vmax.f32 %v760_v36, %v762_v37  ;;  %v178_v63 = vmax.f32 %v780_v46, %v782_v47 }
  0x11   :  { %88 = vadd.xlane.f32.xlu1 %v87_v15  ;;  %v105_v44 = vadd.f32 %v772_v42, %v770_v41  ;;  %998 = vst [vmem:[#allocation11_spill] sm:$0xff] %v790_v51  ;;  %v792_v52 = vld [vmem:[#allocation2 + $0xf8] sm:$0xff]  ;;  %v169_v60 = vmax.f32 %v770_v41, %v772_v42 }
  0x12   :  { %91 = vadd.xlane.f32.xlu2 %v90_v16  ;;  %999 = vst [vmem:[#allocation12_spill] sm:$0xff] %v792_v52  ;;  %v117_v54 = vadd.f32 %v792_v52, %v790_v51  ;;  %v181_v62 = vmax.f32 %v790_v51, %v792_v52 }
  0x13   :  { %76 = vadd.xlane.f32.xlu0 %v75_v17 }
  0x19   :  { %100 = vadd.xlane.f32.xlu1 %v99_v24 }
  0x1a   :  { %82 = vadd.xlane.f32.xlu2 %v81_v25 }
  0x1b   :  { %97 = vadd.xlane.f32.xlu0 %v96_v26 }
  0x21   :  { %103 = vadd.xlane.f32.xlu1 %v102_v33  ;;  %v187_v33 = vld [vmem:[%s983_s1 + $0x18] sm:$0xff] }
  0x22   :  { %109 = vadd.xlane.f32.xlu2 %v108_v34  ;;  %334 = vmatpush.msra.mxu1 %v187_v33 }
  0x23   :  { %94 = vadd.xlane.f32.xlu0 %v93_v35 }
  0x29   :  { %137 = vmax.xlane.f32.xlu1 %v136_v38 }
  0x2a   :  { %140 = vmax.xlane.f32.xlu2 %v139_v39  ;;  %v186_v39 = vld [vmem:[%s983_s1 + $0x10] sm:$0xff] }
  0x2b   :  { %112 = vadd.xlane.f32.xlu0 %v111_v40  ;;  %335 = vmatpush.msra.mxu1 %v186_v39  ;;  %v185_v40 = vld [vmem:[%s983_s1 + $0x8] sm:$0xff] }
  0x2d   :  { %336 = vmatpush.msra.mxu1 %v185_v40 }
  0x31   :  { %152 = vmax.xlane.f32.xlu1 %v151_v43  ;;  %v184_v43 = vld [vmem:[%s983_s1] sm:$0xff] }
  0x32   :  { %106 = vadd.xlane.f32.xlu2 %v105_v44  ;;  %337 = vmatpush.msra.mxu1 %v184_v43 }
  0x33   :  { %149 = vmax.xlane.f32.xlu0 %v148_v45 }
  0x39   :  { %143 = vmax.xlane.f32.xlu1 %v142_v48 }
  0x3a   :  { %155 = vmax.xlane.f32.xlu2 %v154_v49  ;;  %v989_v49 = vlaneseq }
  0x3b   :  { %115 = vadd.xlane.f32.xlu0 %v114_v50 }
  0x41   :  { %164 = vmax.xlane.f32.xlu1 %v163_v53 }
  0x42   :  { %118 = vadd.xlane.f32.xlu2 %v117_v54 }
  0x43   :  { %161 = vmax.xlane.f32.xlu0 %v160_v55  ;;  %v837_v55 = vand.u32 127, %v989_v49 }
  0x49   :  { %158 = vmax.xlane.f32.xlu1 %v157_v56  ;;  %v191_v56 = vld [vmem:[%s984_s2 + $0x18] sm:$0xff] }
  0x4a   :  { %167 = vmax.xlane.f32.xlu2 %v166_v57  ;;  %265 = vmatpush.msra.mxu0 %v191_v56  ;;  %v843_v57 = vadd.s32 4294967288, %v837_v55  ;;  %v190_v56 = vld [vmem:[%s984_s2 + $0x10] sm:$0xff] }
  0x4b   :  { %146 = vmax.xlane.f32.xlu0 %v145_v58 }
  0x4c   :  { %266 = vmatpush.msra.mxu0 %v190_v56 }
  0x51   :  { %176 = vmax.xlane.f32.xlu1 %v175_v59 }
  0x52   :  { %170 = vmax.xlane.f32.xlu2 %v169_v60  ;;  %v846_v60 = vadd.s32 4294967280, %v837_v55 }
  0x53   :  { %173 = vmax.xlane.f32.xlu0 %v172_v61 }
  0x59   :  { %182 = vmax.xlane.f32.xlu1 %v181_v62 }
  0x5b   :  { %179 = vmax.xlane.f32.xlu0 %v178_v63 }
  0x7c   :  { %v86_v3 = vpop.xlane.xlu1 %85 }
  0x7d   :  { %v80_v7 = vpop.xlane.xlu2 %79  ;;  %v124_v59 = vmul.f32 0.00390625, %v86_v3 }
  0x7e   :  { %v74_v8 = vpop.xlane.xlu0 %73  ;;  %v122_v51 = vmul.f32 0.00390625, %v80_v7 }
  0x84   :  { %v89_v15 = vpop.xlane.xlu1 %88 }
  0x85   :  { %v92_v16 = vpop.xlane.xlu2 %91  ;;  %v125_v58 = vmul.f32 0.00390625, %v89_v15  ;;  %v120_v15 = vmul.f32 0.00390625, %v74_v8 }
  0x86   :  { %v77_v17 = vpop.xlane.xlu0 %76  ;;  %v126_v63 = vmul.f32 0.00390625, %v92_v16  ;;  %v858_v16 = vadd.s32 4294967272, %v837_v55 }
  0x87   :  { %v121_v61 = vmul.f32 0.00390625, %v77_v17  ;;  %v297_v3 = vperm.slane %v125_v58, %v843_v57  ;;  %v296_v17 = vperm.slane %v124_v59, %v837_v55  ;;  %v289_v59 = vperm.slane %v120_v15, %v837_v55 }
  0x88   :  { %v299_v7 = vperm.slane %v126_v63, %v846_v60 }
  0x89   :  { %v290_v47 = vperm.slane %v121_v61, %v843_v57  ;;  %v298_v56 = vsel %vm213_vm0, %v297_v3, %v296_v17 }
  0x8a   :  { %v300_v3 = vsel %vm217_vm1, %v299_v7, %v298_v56 }
  0x8b   :  { %v291_v63 = vsel %vm213_vm0, %v290_v47, %v289_v59 }
  0x8c   :  { %v101_v24 = vpop.xlane.xlu1 %100 }
  0x8d   :  { %v83_v25 = vpop.xlane.xlu2 %82  ;;  %v129_v33 = vmul.f32 0.00390625, %v101_v24 }
  0x8e   :  { %v98_v26 = vpop.xlane.xlu0 %97  ;;  %v123_v46 = vmul.f32 0.00390625, %v83_v25 }
  0x8f   :  { %v128_v39 = vmul.f32 0.00390625, %v98_v26  ;;  %v189_v26 = vld [vmem:[%s984_s2 + $0x8] sm:$0xff] }
  0x90   :  { %267 = vmatpush.msra.mxu0 %v189_v26 }
  0x94   :  { %v104_v34 = vpop.xlane.xlu1 %103 }
  0x95   :  { %v110_v35 = vpop.xlane.xlu2 %109  ;;  %v130_v49 = vmul.f32 0.00390625, %v104_v34  ;;  %v188_v34 = vld [vmem:[%s984_s2] sm:$0xff] }
  0x96   :  { %v95_v38 = vpop.xlane.xlu0 %94  ;;  %v132_v8 = vmul.f32 0.00390625, %v110_v35  ;;  %268 = vmatpush.msra.mxu0 %v188_v34 }
  0x97   :  { %v127_v52 = vmul.f32 0.00390625, %v95_v38  ;;  %v304_v38 = vperm.slane %v129_v33, %v843_v57  ;;  %v306_v25 = vperm.slane %v130_v49, %v846_v60  ;;  %v294_v33 = vperm.slane %v123_v46, %v858_v16 }
  0x99   :  { %v301_v35 = vperm.slane %v127_v52, %v858_v16 }
  0x9b   :  { %v302_v47 = vsel %vm221_vm2, %v301_v35, %v300_v3 }
  0x9c   :  { %v828_v44 = vpop.xlane.xlu1 %137 }
  0x9d   :  { %v830_v45 = vpop.xlane.xlu2 %140 }
  0x9e   :  { %v113_v48 = vpop.xlane.xlu0 %112 }
  0x9f   :  { %v133_v30 = vmul.f32 0.00390625, %v113_v48  ;;  %v292_v48 = vperm.slane %v122_v51, %v846_v60 }
  0xa1   :  { %v293_v46 = vsel %vm217_vm1, %v292_v48, %v291_v63 }
  0xa4   :  { %v832_v50 = vpop.xlane.xlu1 %152 }
  0xa5   :  { %v107_v53 = vpop.xlane.xlu2 %106 }
  0xa6   :  { %v834_v54 = vpop.xlane.xlu0 %149  ;;  %v131_v24 = vmul.f32 0.00390625, %v107_v53  ;;  %v303_v53 = vperm.slane %v128_v39, %v837_v55  ;;  %v310_v39 = vperm.slane %v132_v8, %v837_v55  ;;  %v295_v8 = vsel %vm221_vm2, %v294_v33, %v293_v46 }
  0xa7   :  { %v212_v33 = vperm.slane %v830_v45, %v843_v57  ;;  %v223_v3 = vperm.slane %v834_v54, %v837_v55 }
  0xa8   :  { %v308_v61 = vperm.slane %v131_v24, %v858_v16  ;;  %v305_v49 = vsel %vm213_vm0, %v304_v38, %v303_v53  ;;  %v317_v53 = vsel %vm244_vm3, %v302_v47, %v295_v8 }
  0xa9   :  { %v307_v24 = vsel %vm217_vm1, %v306_v25, %v305_v49 }
  0xac   :  { %v848_v62 = vpop.xlane.xlu1 %143 }
  0xad   :  { %v850_v40 = vpop.xlane.xlu2 %155 }
  0xae   :  { %v116_v43 = vpop.xlane.xlu0 %115 }
  0xaf   :  { %v134_v58 = vmul.f32 0.00390625, %v116_v43  ;;  %v311_v43 = vperm.slane %v133_v30, %v843_v57  ;;  %v309_v30 = vsel %vm221_vm2, %v308_v61, %v307_v24 }
  0xb0   :  { %v318_v59 = vsel %vm246_vm4, %v309_v30, %v317_v53 }
  0xb1   :  { %v313_v52 = vperm.slane %v134_v58, %v846_v60  ;;  %v312_v34 = vsel %vm213_vm0, %v311_v43, %v310_v39  ;;  %v210_v39 = vperm.slane %v828_v44, %v837_v55  ;;  %v224_v43 = vperm.slane %v832_v50, %v843_v57 }
  0xb3   :  { %v314_v38 = vsel %vm217_vm1, %v313_v52, %v312_v34  ;;  %v226_v52 = vperm.slane %v850_v40, %v846_v60  ;;  %v214_v54 = vsel %vm213_vm0, %v212_v33, %v210_v39  ;;  %v225_v46 = vsel %vm213_vm0, %v224_v43, %v223_v3  ;;  %v589_v43 = vld [vmem:[%s985_s3] ss:$0 sm:$0xff]  ;;  %s646_s3 = smov [#allocation5]  }
  0xb4   :  { %v165_v15 = vpop.xlane.xlu1 %164 }
  0xb5   :  { %v119_v17 = vpop.xlane.xlu2 %118  ;;  %v231_v24 = vperm.slane %v165_v15, %v843_v57  ;;  %v227_v15 = vsel %vm217_vm1, %v226_v52, %v225_v46 }
  0xb6   :  { %v162_v51 = vpop.xlane.xlu0 %161  ;;  %v135_v26 = vmul.f32 0.00390625, %v119_v17  ;;  %v216_v17 = vperm.slane %v848_v62, %v846_v60 }
  0xb7   :  { %v230_v45 = vperm.slane %v162_v51, %v837_v55 }
  0xb8   :  { %v315_v7 = vperm.slane %v135_v26, %v858_v16  ;;  %v218_v51 = vsel %vm217_vm1, %v216_v17, %v214_v54 }
  0xb9   :  { %v232_v30 = vsel %vm213_vm0, %v231_v24, %v230_v45  ;;  %v590_v45 = vld [vmem:[%s987_s5] ss:$0 sm:$0xff]  ;;  %s549_s5 = sshll.u32 %s646_s3, 4  ;;  %s550_s5 = int_to_ptr.vmem [resolvable:$true] %s549_s5 }
  0xba   :  { %v316_v58 = vsel %vm221_vm2, %v315_v7, %v314_v38 }
  0xbb   :  { %v319_v56 = vsel %vm248_vm5, %v316_v58, %v318_v59 }
  0xbc   :  { %565 = vmatmul.msk.f32.vlgmr.msra.gmra.mxu1 %vm250_vm6, %v319_v56  ;;  %v159_v25 = vpop.xlane.xlu1 %158 }
  0xbd   :  { %v168_v35 = vpop.xlane.xlu2 %167  ;;  %v228_v44 = vperm.slane %v159_v25, %v858_v16 }
  0xbe   :  { %v147_v48 = vpop.xlane.xlu0 %146  ;;  %v233_v47 = vperm.slane %v168_v35, %v846_v60 }
  0xbf   :  { %v220_v50 = vperm.slane %v147_v48, %v858_v16  ;;  %v229_v7 = vsel %vm221_vm2, %v228_v44, %v227_v15 }
  0xc0   :  { %v234_v34 = vsel %vm217_vm1, %v233_v47, %v232_v30 }
  0xc1   :  { %v222_v38 = vsel %vm221_vm2, %v220_v50, %v218_v51 }
  0xc2   :  { %v245_v25 = vsel %vm244_vm3, %v229_v7, %v222_v38 }
  0xc4   :  { %v177_v61 = vpop.xlane.xlu1 %176 }
  0xc5   :  { %v171_v49 = vpop.xlane.xlu2 %170  ;;  %v238_v40 = vperm.slane %v177_v61, %v843_v57 }
  0xc6   :  { %v174_v63 = vpop.xlane.xlu0 %173  ;;  %v235_v26 = vperm.slane %v171_v49, %v858_v16 }
  0xc7   :  { %v237_v62 = vperm.slane %v174_v63, %v837_v55 }
  0xc8   :  { %v236_v57 = vsel %vm221_vm2, %v235_v26, %v234_v34 }
  0xc9   :  { %v239_v59 = vsel %vm213_vm0, %v238_v40, %v237_v62  ;;  %v247_v48 = vsel %vm246_vm4, %v236_v57, %v245_v25 }
  0xcc   :  { %v183_v8 = vpop.xlane.xlu1 %182 }
  0xcd   :  { %v242_v58 = vperm.slane %v183_v8, %v858_v16  ;;  %v348_v16 = vld [vmem:[%s986_s4] sm:$0x3] }
  0xce   :  { %v180_v53 = vpop.xlane.xlu0 %179  ;;  %566 = vmatpush.msk.msra.mxu2 %vm357_vm7, %v348_v16 }
  0xcf   :  { %v240_v55 = vperm.slane %v180_v53, %v846_v60  ;;  %v1000_v60 = vlaneseq }
  0xd1   :  { %v241_v56 = vsel %vm217_vm1, %v240_v55, %v239_v59  ;;  %v383_v63 = vshrl.u32 %v1000_v60, 7 }
  0xd2   :  { %v243_v35 = vsel %vm221_vm2, %v242_v58, %v241_v56 }
  0xd3   :  { %v249_v61 = vsel %vm248_vm5, %v243_v35, %v247_v48  ;;  %572 = vset.pattern.permute.xlu2 %v383_v63  ;;  %v396_v33 = vadd.s32 16, %v383_v63  ;;  %v390_v39 = vadd.s32 8, %v383_v63  ;;  %v402_v26 = vadd.s32 24, %v383_v63 }
  0xd4   :  { %564 = vmatmul.msk.f32.vlgmr.msra.gmra.mxu0 %vm250_vm6, %v249_v61 }
  0xd5   :  { %574 = vset.pattern.permute.xlu1 %v396_v33  ;;  %573 = vset.pattern.permute.xlu0 %v390_v39 }
 0x139   :  { %v339_v3 = vpop.f32.mrf.mxu1 }
 0x151   :  { %v270_v49 = vpop.f32.mrf.mxu0 }
 0x152   :  { %v340_v52 = vadd.f32 %v339_v3, %v270_v49  ;;  %v1005_v3 = vld [vmem:[#allocation12_spill] sm:$0xff] }
 0x154   :  { %v346_v17 = vadd.f32 %v589_v43, %v340_v52 }
 0x156   :  { %v347_v24 = vmax.f32 %v346_v17, 0.0 }
 0x158   :  { %567 = vmatmul.msk.f32.vlgmr.msra.gmra.mxu2 %vm353_vm8, %v347_v24 }
 0x1db   :  { %v378_v47 = vpop.f32.mrf.mxu2 }
 0x1dc   :  { %v379_v44 = vadd.f32 %v590_v45, %v378_v47 }
 0x1de   :  { %v381_v50 = vperm.slane %v379_v44, 0  ;;  %v406_v54 = vperm.slane %v379_v44, 1  ;;  %v431_v46 = vperm.slane %v379_v44, 2  ;;  %v456_v40 = vperm.slane %v379_v44, 3 }
 0x1e0   :  { %398 = vperm.xlu1 %574, %v381_v50   ;;  %392 = vperm.xlu0 %573, %v381_v50  }
 0x1e1   :  { %386 = vperm.xlu2 %572, %v381_v50  }
 0x1e8   :  { %577 = vset.pattern.permute.xlu1 %v390_v39  ;;  %580 = vset.pattern.permute.xlu0 %v383_v63 }
 0x1e9   :  { %575 = vset.pattern.permute.xlu2 %v402_v26 }
 0x1f0   :  { %417 = vperm.xlu1 %577, %v406_v54   ;;  %436 = vperm.xlu0 %580, %v431_v46  }
 0x1f1   :  { %404 = vperm.xlu2 %575, %v381_v50  }
 0x1f8   :  { %579 = vset.pattern.permute.xlu1 %v402_v26  ;;  %585 = vset.pattern.permute.xlu0 %v390_v39 }
 0x1f9   :  { %576 = vset.pattern.permute.xlu2 %v383_v63 }
 0x200   :  { %429 = vperm.xlu1 %579, %v406_v54   ;;  %467 = vperm.xlu0 %585, %v456_v40  }
 0x201   :  { %411 = vperm.xlu2 %576, %v406_v54  }
 0x208   :  { %582 = vset.pattern.permute.xlu1 %v396_v33  ;;  %588 = vset.pattern.permute.xlu0 %v402_v26 }
 0x209   :  { %578 = vset.pattern.permute.xlu2 %v396_v33 }
 0x210   :  { %448 = vperm.xlu1 %582, %v431_v46  }
 0x211   :  { %423 = vperm.xlu2 %578, %v406_v54  }
 0x218   :  { %584 = vset.pattern.permute.xlu1 %v383_v63 }
 0x219   :  { %581 = vset.pattern.permute.xlu2 %v390_v39 }
 0x220   :  { %461 = vperm.xlu1 %584, %v456_v40  }
 0x221   :  { %442 = vperm.xlu2 %581, %v431_v46  }
 0x228   :  { %587 = vset.pattern.permute.xlu1 %v402_v26 }
 0x229   :  { %583 = vset.pattern.permute.xlu2 %v402_v26 }
 0x230   :  { %479 = vperm.xlu1 %587, %v456_v40  }
 0x231   :  { %454 = vperm.xlu2 %583, %v431_v46  }
 0x239   :  { %586 = vset.pattern.permute.xlu2 %v396_v33 }
 0x23b   :  { %v387_v62 = vpop.permute.xlu2 %386 }
 0x23c   :  { %v481_v15 = vmul.f32 %v387_v62, %v698_v5  ;;  %v482_v51 = vmul.f32 %v387_v62, %v700_v6 }
 0x23e   :  { %513 = vst [vmem:[#allocation5] sm:$0xff] %v481_v15 }
 0x23f   :  { %514 = vst [vmem:[#allocation5 + $0x8] sm:$0xff] %v482_v51 }
 0x241   :  { %473 = vperm.xlu2 %586, %v456_v40  }
 0x24b   :  { %v405_v30 = vpop.permute.xlu2 %404 }
 0x24c   :  { %v487_v8 = vmul.f32 %v405_v30, %v728_v20  ;;  %v488_v34 = vmul.f32 %v405_v30, %v730_v21 }
 0x24e   :  { %519 = vst [vmem:[#allocation5 + $0x30] sm:$0xff] %v487_v8 }
 0x24f   :  { %520 = vst [vmem:[#allocation5 + $0x38] sm:$0xff] %v488_v34 }
 0x252   :  { %v399_v7 = vpop.permute.xlu1 %398  ;;  %v393_v38 = vpop.permute.xlu0 %392 }
 0x253   :  { %v485_v53 = vmul.f32 %v399_v7, %v692_v2  ;;  %v486_v58 = vmul.f32 %v399_v7, %v696_v4  ;;  %v483_v5 = vmul.f32 %v393_v38, %v714_v13  ;;  %v484_v6 = vmul.f32 %v393_v38, %v716_v14 }
 0x255   :  { %517 = vst [vmem:[#allocation5 + $0x20] sm:$0xff] %v485_v53 }
 0x256   :  { %518 = vst [vmem:[#allocation5 + $0x28] sm:$0xff] %v486_v58 }
 0x257   :  { %515 = vst [vmem:[#allocation5 + $0x10] sm:$0xff] %v483_v5 }
 0x258   :  { %516 = vst [vmem:[#allocation5 + $0x18] sm:$0xff] %v484_v6 }
 0x25b   :  { %v412_v57 = vpop.permute.xlu2 %411 }
 0x25c   :  { %v489_v20 = vmul.f32 %v412_v57, %v688_v0  ;;  %v490_v21 = vmul.f32 %v412_v57, %v690_v1 }
 0x25e   :  { %521 = vst [vmem:[#allocation5 + $0x40] sm:$0xff] %v489_v20 }
 0x25f   :  { %522 = vst [vmem:[#allocation5 + $0x48] sm:$0xff] %v490_v21 }
 0x262   :  { %v418_v55 = vpop.permute.xlu1 %417  ;;  %v437_v59 = vpop.permute.xlu0 %436 }
 0x263   :  { %v491_v2 = vmul.f32 %v418_v55, %v706_v9  ;;  %v492_v4 = vmul.f32 %v418_v55, %v708_v10  ;;  %v497_v13 = vmul.f32 %v437_v59, %v732_v22  ;;  %v498_v14 = vmul.f32 %v437_v59, %v734_v23 }
 0x265   :  { %523 = vst [vmem:[#allocation5 + $0x50] sm:$0xff] %v491_v2 }
 0x266   :  { %524 = vst [vmem:[#allocation5 + $0x58] sm:$0xff] %v492_v4 }
 0x267   :  { %529 = vst [vmem:[#allocation5 + $0x80] sm:$0xff] %v497_v13 }
 0x268   :  { %530 = vst [vmem:[#allocation5 + $0x88] sm:$0xff] %v498_v14 }
 0x26b   :  { %v424_v56 = vpop.permute.xlu2 %423 }
 0x26c   :  { %v493_v0 = vmul.f32 %v424_v56, %v710_v11  ;;  %v494_v1 = vmul.f32 %v424_v56, %v712_v12 }
 0x26e   :  { %525 = vst [vmem:[#allocation5 + $0x60] sm:$0xff] %v493_v0 }
 0x26f   :  { %526 = vst [vmem:[#allocation5 + $0x68] sm:$0xff] %v494_v1 }
 0x272   :  { %v430_v25 = vpop.permute.xlu1 %429  ;;  %v468_v35 = vpop.permute.xlu0 %467 }
 0x273   :  { %v495_v9 = vmul.f32 %v430_v25, %v750_v31  ;;  %v496_v10 = vmul.f32 %v430_v25, %v752_v32  ;;  %v507_v22 = vmul.f32 %v468_v35, %v760_v36  ;;  %v508_v23 = vmul.f32 %v468_v35, %v762_v37 }
 0x275   :  { %527 = vst [vmem:[#allocation5 + $0x70] sm:$0xff] %v495_v9 }
 0x276   :  { %528 = vst [vmem:[#allocation5 + $0x78] sm:$0xff] %v496_v10 }
 0x277   :  { %539 = vst [vmem:[#allocation5 + $0xd0] sm:$0xff] %v507_v22 }
 0x278   :  { %540 = vst [vmem:[#allocation5 + $0xd8] sm:$0xff] %v508_v23 }
 0x27b   :  { %v443_v48 = vpop.permute.xlu2 %442 }
 0x27c   :  { %v499_v11 = vmul.f32 %v443_v48, %v724_v18  ;;  %v500_v12 = vmul.f32 %v443_v48, %v726_v19  ;;  %v1001_v19 = vld [vmem:[#allocation8_spill] sm:$0xff] }
 0x27e   :  { %531 = vst [vmem:[#allocation5 + $0x90] sm:$0xff] %v499_v11 }
 0x27f   :  { %532 = vst [vmem:[#allocation5 + $0x98] sm:$0xff] %v500_v12 }
 0x282   :  { %v449_v61 = vpop.permute.xlu1 %448 }
 0x283   :  { %v501_v31 = vmul.f32 %v449_v61, %v742_v27  ;;  %v502_v32 = vmul.f32 %v449_v61, %v744_v28  ;;  %v1002_v27 = vld [vmem:[#allocation9_spill] sm:$0xff]  ;;  %v1003_v28 = vld [vmem:[#allocation10_spill] sm:$0xff] }
 0x285   :  { %533 = vst [vmem:[#allocation5 + $0xa0] sm:$0xff] %v501_v31 }
 0x286   :  { %534 = vst [vmem:[#allocation5 + $0xa8] sm:$0xff] %v502_v32 }
 0x28b   :  { %v455_v36 = vpop.permute.xlu2 %454 }
 0x28c   :  { %v503_v37 = vmul.f32 %v455_v36, %v770_v41  ;;  %v504_v16 = vmul.f32 %v455_v36, %v772_v42  ;;  %v1004_v42 = vld [vmem:[#allocation11_spill] sm:$0xff] }
 0x28e   :  { %535 = vst [vmem:[#allocation5 + $0xb0] sm:$0xff] %v503_v37 }
 0x28f   :  { %536 = vst [vmem:[#allocation5 + $0xb8] sm:$0xff] %v504_v16 }
 0x292   :  { %v462_v60 = vpop.permute.xlu1 %461 }
 0x293   :  { %v505_v18 = vmul.f32 %v462_v60, %v746_v29  ;;  %v506_v63 = vmul.f32 %v462_v60, %v1001_v19 }
 0x295   :  { %537 = vst [vmem:[#allocation5 + $0xc0] sm:$0xff] %v505_v18 }
 0x296   :  { %538 = vst [vmem:[#allocation5 + $0xc8] sm:$0xff] %v506_v63 }
 0x29b   :  { %v474_v33 = vpop.permute.xlu2 %473 }
 0x29c   :  { %v509_v39 = vmul.f32 %v474_v33, %v1002_v27  ;;  %v510_v43 = vmul.f32 %v474_v33, %v1003_v28 }
 0x29e   :  { %541 = vst [vmem:[#allocation5 + $0xe0] sm:$0xff] %v509_v39 }
 0x29f   :  { %542 = vst [vmem:[#allocation5 + $0xe8] sm:$0xff] %v510_v43 }
 0x2a2   :  { %v480_v41 = vpop.permute.xlu1 %479 }
 0x2a3   :  { %v511_v29 = vmul.f32 %v480_v41, %v1004_v42  ;;  %v512_v49 = vmul.f32 %v480_v41, %v1005_v3 }
 0x2a5   :  { %543 = vst [vmem:[#allocation5 + $0xf0] sm:$0xff] %v511_v29 }
 0x2a6   :  { %544 = vst [vmem:[#allocation5 + $0xf8] sm:$0xff] %v512_v49 }
 0x2a7   :  { %557 = dma.vmem_to_hbm [thread:$0]  %s550_s5, 4096, %s552_s24, [#allocation4], %s644_s26, %s644_s26, %s645_s27  }
 0x2a8   :  { %641 = dma.done.wait [#allocation4], 4096  }
 0x2a9   :  { %642 = vsyncadd [#allocation4], 4294963200 }
 0x2aa   :  { %562 = vsyncpa [#allocation3], 1 }
 0x2ab   :  { %563 = vsyncpa [#allocation4], 1 }

</bundles_post_ra>
